<compile_context>
chip_gen: v5e
topology: v5e:2x2
jax: 0.10.0
libtpu: 0.0.40
codegen_flags: <defaults>
</compile_context>

<pallas_src>
import jax
import jax.numpy as jnp
from jax.experimental import pallas as pl
from jax.experimental.pallas import tpu as pltpu

LANES = 128


def conv3x3_relu_kernel(x_ref, w_ref, b_ref, o_ref):
    # x_ref: (1, TH+2, W+2, Cin)   bf16 input slab (one H-tile + 2-row halo)
    # w_ref: (9, Cin, Cout_pad)    bf16 weights, tap-major
    # b_ref: (1, Cout_pad)         f32 bias (zero-padded channels)
    # o_ref: (1, TH*W, Cout_pad)   bf16 output tile, lane-dense last dim
    _, THp, Wp, Cin = x_ref.shape
    TH, W = THp - 2, Wp - 2
    HWt, Cpad = o_ref.shape[1], o_ref.shape[2]

    x = x_ref[0]                                      # bf16, no f32 cast pass

    # Split-K over the 9 conv taps: consecutive bf16 matmuls accumulated into a
    # single f32 accumulator (MRB-friendly on v7x, no im2col scratch / masked
    # patch stores anywhere).
    acc = jnp.zeros((HWt, Cpad), jnp.float32)
    for kh in range(3):
        for kw in range(3):
            tap = x[kh:kh + TH, kw:kw + W, :].reshape(HWt, Cin)     # bf16
            acc = acc + jnp.dot(tap, w_ref[kh * 3 + kw],
                                preferred_element_type=jnp.float32)

    # f32 epilogue (bias + ReLU) on the VPU, then one unmasked bf16 store.
    out = jnp.maximum(acc + b_ref[...], 0.0)
    o_ref[...] = out.reshape(1, HWt, Cpad).astype(o_ref.dtype)


def _pick_tile_h(h):
    """Largest multiple-of-8 H-tile that divides H and still yields >= 2 tiles."""
    for th in (32, 24, 16, 8):
        if h % th == 0 and h // th >= 2:
            return th
    return h


def basic_block_forward(x_nchw, weight, bias, *, tile_h=None):
    """Conv2d(ksize=3, stride=1, pad=1) + ReLU, matching the PyTorch BasicBlock.

    x_nchw: (N, Cin, H, W) float32
    weight: (Cout, Cin, 3, 3)
    bias:   (Cout,)
    returns: (N, Cout, H, W)
    """
    N, Cin, H, W = x_nchw.shape
    Cout = weight.shape[0]
    Cpad = ((Cout + LANES - 1) // LANES) * LANES     # lane-dense output channels

    TH = _pick_tile_h(H) if tile_h is None else tile_h
    assert H % TH == 0, "tile_h must divide H"
    nH = H // TH
    G = N * nH

    # --- wrapper glue (plain XLA): layout, halo, tap-major weights ---
    # TODO(synk): keep the model NHWC end-to-end and fetch the halo'd H-tiles
    # inside the kernel (Element-indexed overlapping BlockSpec or a manual
    # make_async_copy from a pl.ANY input) so these transpose/pad/stack passes
    # stop costing extra HBM round trips at production sizes.
    x_nhwc = jnp.transpose(x_nchw, (0, 2, 3, 1)).astype(jnp.bfloat16)
    x_pad = jnp.pad(x_nhwc, ((0, 0), (1, 1), (1, 1), (0, 0)))   # (N, H+2, W+2, Cin)
    x_tiles = jnp.stack(
        [x_pad[:, i * TH:i * TH + TH + 2] for i in range(nH)], axis=1)
    x_tiles = x_tiles.reshape(G, TH + 2, W + 2, Cin)            # halo'd H-tiles

    # (Cout, Cin, kh, kw) -> (kh, kw, cin, cout) -> (9, Cin, Cpad), bf16.
    w_taps = jnp.transpose(weight, (2, 3, 1, 0)).reshape(9, Cin, Cout)
    w_taps = jnp.pad(w_taps, ((0, 0), (0, 0), (0, Cpad - Cout))).astype(jnp.bfloat16)
    b_mat = jnp.pad(bias, (0, Cpad - Cout)).astype(jnp.float32).reshape(1, Cpad)

    # TODO(synk): for Cin << 128 (early layers / this test) repack lanes densely
    # (fold W into the lane axis or pad Cin) so tap vregs aren't mostly empty.

    cost = pl.CostEstimate(
        flops=2 * N * H * W * 9 * Cin * Cpad,
        transcendentals=0,
        bytes_accessed=(x_tiles.size * 2 + w_taps.size * 2 + b_mat.size * 4
                        + G * TH * W * Cpad * 2),
    )

    out = pl.pallas_call(
        conv3x3_relu_kernel,
        out_shape=jax.ShapeDtypeStruct((G, TH * W, Cpad), jnp.bfloat16),
        grid_spec=pltpu.PrefetchScalarGridSpec(
            num_scalar_prefetch=0,
            grid=(N, nH),
            in_specs=[
                pl.BlockSpec((1, TH + 2, W + 2, Cin),
                             lambda n, h: (n * nH + h, 0, 0, 0)),
                pl.BlockSpec((9, Cin, Cpad), lambda n, h: (0, 0, 0)),
                pl.BlockSpec((1, Cpad), lambda n, h: (0, 0)),
            ],
            out_specs=pl.BlockSpec((1, TH * W, Cpad),
                                   lambda n, h: (n * nH + h, 0, 0)),
        ),
        compiler_params=pltpu.CompilerParams(
            dimension_semantics=("parallel", "parallel"),
            # H-tiles are sized to stay well under v7x's 64 MiB VMEM; on
            # v6e/v5e (128 MiB physical) this limit is comfortably legal and
            # well above the default scoped limit so bigger tiles also fit.
            vmem_limit_bytes=48 * 1024 * 1024,
        ),
        cost_estimate=cost,
    )(x_tiles, w_taps, b_mat)

    # Slice the real channels, restore NCHW (f32 only at the boundary).
    out = out[:, :, :Cout].reshape(N, H, W, Cout)
    return jnp.transpose(out, (0, 3, 1, 2)).astype(x_nchw.dtype)


def init_basic_block_params(key, in_channels, out_channels, ksize=3):
    """Deterministic init mimicking PyTorch Conv2d defaults (uniform ±1/sqrt(fan_in))."""
    kw_key, kb_key = jax.random.split(key)
    fan_in = in_channels * ksize * ksize
    bound = 1.0 / jnp.sqrt(float(fan_in))
    weight = jax.random.uniform(
        kw_key, (out_channels, in_channels, ksize, ksize),
        minval=-bound, maxval=bound, dtype=jnp.float32)
    bias = jax.random.uniform(
        kb_key, (out_channels,), minval=-bound, maxval=bound, dtype=jnp.float32)
    return weight, bias


if __name__ == "__main__":
    key = jax.random.PRNGKey(0)
    x_key, p_key = jax.random.split(key)

    N, Cin, H, W = 2, 4, 16, 16
    Cout = 8

    x = jax.random.normal(x_key, (N, Cin, H, W), dtype=jnp.float32)
    weight, bias = init_basic_block_params(p_key, Cin, Cout, ksize=3)

    out = basic_block_forward(x, weight, bias)
    out = jax.block_until_ready(out)

    # Reference: same conv semantics as nn.Conv2d, on the same bf16-rounded
    # activations/weights the kernel feeds the MXU (f32 accumulation); the
    # kernel additionally rounds its output to bf16, hence the tolerance.
    xb = x.astype(jnp.bfloat16).astype(jnp.float32)
    wb = weight.astype(jnp.bfloat16).astype(jnp.float32)
    ref = jax.lax.conv_general_dilated(
        xb, wb, window_strides=(1, 1), padding=((1, 1), (1, 1)),
        dimension_numbers=("NCHW", "OIHW", "NCHW"),
        precision=jax.lax.Precision.HIGHEST)
    ref = jnp.maximum(ref + bias[None, :, None, None], 0.0)

    assert out.shape == (N, Cout, H, W)
    assert jnp.allclose(out, ref, atol=2e-2, rtol=2e-2), (
        float(jnp.max(jnp.abs(out - ref))))

    print("KERNEL_OK")
</pallas_src>

<mosaic_0001>
module attributes {stable_mosaic.version = 11 : i64} {
  func.func @conv3x3_relu_kernel(%arg0: i32, %arg1: i32, %arg2: memref<1x10x18x4xbf16, #tpu.memory_space<vmem>>, %arg3: memref<9x4x128xbf16, #tpu.memory_space<vmem>>, %arg4: memref<1x128xf32, #tpu.memory_space<vmem>>, %arg5: memref<1x128x128xbf16, #tpu.memory_space<vmem>>) attributes {dimension_semantics = [#tpu.dimension_semantics<parallel>, #tpu.dimension_semantics<parallel>], iteration_bounds = array<i64: 2, 2>, scalar_prefetch = 0 : i64, scratch_operands = 0 : i64, tpu.core_type = #tpu.core_type<tc>, window_params = [{transform_indices = @transform_0, window_bounds = array<i64: 1, 10, 18, 4>}, {pipeline_mode = #tpu.pipeline_mode<synchronous>, transform_indices = @transform_1, window_bounds = array<i64: 9, 4, 128>}, {pipeline_mode = #tpu.pipeline_mode<synchronous>, transform_indices = @transform_2, window_bounds = array<i64: 1, 128>}, {transform_indices = @transform_3, window_bounds = array<i64: 1, 128, 128>}]} {
    %c0 = arith.constant 0 : index
    %c0_0 = arith.constant 0 : index
    %c0_1 = arith.constant 0 : index
    %c0_2 = arith.constant 0 : index
    %0 = vector.load %arg2[%c0, %c0_0, %c0_1, %c0_2] : memref<1x10x18x4xbf16, #tpu.memory_space<vmem>>, vector<1x10x18x4xbf16>
    %1 = vector.shape_cast %0 : vector<1x10x18x4xbf16> to vector<10x18x4xbf16>
    %cst = arith.constant 0.000000e+00 : f32
    %2 = vector.broadcast %cst : f32 to vector<128x128xf32>
    %3 = vector.extract_strided_slice %1 {offsets = [0, 0, 0], sizes = [8, 16, 4], strides = [1, 1, 1]} : vector<10x18x4xbf16> to vector<8x16x4xbf16>
    %4 = vector.shape_cast %3 : vector<8x16x4xbf16> to vector<128x4xbf16>
    %c0_3 = arith.constant 0 : index
    %c0_4 = arith.constant 0 : index
    %c0_5 = arith.constant 0 : index
    %5 = vector.load %arg3[%c0_3, %c0_4, %c0_5] : memref<9x4x128xbf16, #tpu.memory_space<vmem>>, vector<1x4x128xbf16>
    %6 = vector.shape_cast %5 : vector<1x4x128xbf16> to vector<4x128xbf16>
    %cst_6 = arith.constant dense<0.000000e+00> : vector<128x128xf32>
    %7 = tpu.matmul %4, %6, %cst_6 {dimension_numbers = #tpu.dot_dimension_numbers<[1], [0], [0], [1], [0, 0, 1, 1], [], []>} : vector<128x4xbf16>, vector<4x128xbf16>, vector<128x128xf32> -> vector<128x128xf32>
    %8 = arith.addf %2, %7 : vector<128x128xf32>
    %9 = vector.extract_strided_slice %1 {offsets = [0, 1, 0], sizes = [8, 16, 4], strides = [1, 1, 1]} : vector<10x18x4xbf16> to vector<8x16x4xbf16>
    %10 = vector.shape_cast %9 : vector<8x16x4xbf16> to vector<128x4xbf16>
    %c1 = arith.constant 1 : index
    %c0_7 = arith.constant 0 : index
    %c0_8 = arith.constant 0 : index
    %11 = vector.load %arg3[%c1, %c0_7, %c0_8] : memref<9x4x128xbf16, #tpu.memory_space<vmem>>, vector<1x4x128xbf16>
    %12 = vector.shape_cast %11 : vector<1x4x128xbf16> to vector<4x128xbf16>
    %cst_9 = arith.constant dense<0.000000e+00> : vector<128x128xf32>
    %13 = tpu.matmul %10, %12, %cst_9 {dimension_numbers = #tpu.dot_dimension_numbers<[1], [0], [0], [1], [0, 0, 1, 1], [], []>} : vector<128x4xbf16>, vector<4x128xbf16>, vector<128x128xf32> -> vector<128x128xf32>
    %14 = arith.addf %8, %13 : vector<128x128xf32>
    %15 = vector.extract_strided_slice %1 {offsets = [0, 2, 0], sizes = [8, 16, 4], strides = [1, 1, 1]} : vector<10x18x4xbf16> to vector<8x16x4xbf16>
    %16 = vector.shape_cast %15 : vector<8x16x4xbf16> to vector<128x4xbf16>
    %c2 = arith.constant 2 : index
    %c0_10 = arith.constant 0 : index
    %c0_11 = arith.constant 0 : index
    %17 = vector.load %arg3[%c2, %c0_10, %c0_11] : memref<9x4x128xbf16, #tpu.memory_space<vmem>>, vector<1x4x128xbf16>
    %18 = vector.shape_cast %17 : vector<1x4x128xbf16> to vector<4x128xbf16>
    %cst_12 = arith.constant dense<0.000000e+00> : vector<128x128xf32>
    %19 = tpu.matmul %16, %18, %cst_12 {dimension_numbers = #tpu.dot_dimension_numbers<[1], [0], [0], [1], [0, 0, 1, 1], [], []>} : vector<128x4xbf16>, vector<4x128xbf16>, vector<128x128xf32> -> vector<128x128xf32>
    %20 = arith.addf %14, %19 : vector<128x128xf32>
    %21 = vector.extract_strided_slice %1 {offsets = [1, 0, 0], sizes = [8, 16, 4], strides = [1, 1, 1]} : vector<10x18x4xbf16> to vector<8x16x4xbf16>
    %22 = vector.shape_cast %21 : vector<8x16x4xbf16> to vector<128x4xbf16>
    %c3 = arith.constant 3 : index
    %c0_13 = arith.constant 0 : index
    %c0_14 = arith.constant 0 : index
    %23 = vector.load %arg3[%c3, %c0_13, %c0_14] : memref<9x4x128xbf16, #tpu.memory_space<vmem>>, vector<1x4x128xbf16>
    %24 = vector.shape_cast %23 : vector<1x4x128xbf16> to vector<4x128xbf16>
    %cst_15 = arith.constant dense<0.000000e+00> : vector<128x128xf32>
    %25 = tpu.matmul %22, %24, %cst_15 {dimension_numbers = #tpu.dot_dimension_numbers<[1], [0], [0], [1], [0, 0, 1, 1], [], []>} : vector<128x4xbf16>, vector<4x128xbf16>, vector<128x128xf32> -> vector<128x128xf32>
    %26 = arith.addf %20, %25 : vector<128x128xf32>
    %27 = vector.extract_strided_slice %1 {offsets = [1, 1, 0], sizes = [8, 16, 4], strides = [1, 1, 1]} : vector<10x18x4xbf16> to vector<8x16x4xbf16>
    %28 = vector.shape_cast %27 : vector<8x16x4xbf16> to vector<128x4xbf16>
    %c4 = arith.constant 4 : index
    %c0_16 = arith.constant 0 : index
    %c0_17 = arith.constant 0 : index
    %29 = vector.load %arg3[%c4, %c0_16, %c0_17] : memref<9x4x128xbf16, #tpu.memory_space<vmem>>, vector<1x4x128xbf16>
    %30 = vector.shape_cast %29 : vector<1x4x128xbf16> to vector<4x128xbf16>
    %cst_18 = arith.constant dense<0.000000e+00> : vector<128x128xf32>
    %31 = tpu.matmul %28, %30, %cst_18 {dimension_numbers = #tpu.dot_dimension_numbers<[1], [0], [0], [1], [0, 0, 1, 1], [], []>} : vector<128x4xbf16>, vector<4x128xbf16>, vector<128x128xf32> -> vector<128x128xf32>
    %32 = arith.addf %26, %31 : vector<128x128xf32>
    %33 = vector.extract_strided_slice %1 {offsets = [1, 2, 0], sizes = [8, 16, 4], strides = [1, 1, 1]} : vector<10x18x4xbf16> to vector<8x16x4xbf16>
    %34 = vector.shape_cast %33 : vector<8x16x4xbf16> to vector<128x4xbf16>
    %c5 = arith.constant 5 : index
    %c0_19 = arith.constant 0 : index
    %c0_20 = arith.constant 0 : index
    %35 = vector.load %arg3[%c5, %c0_19, %c0_20] : memref<9x4x128xbf16, #tpu.memory_space<vmem>>, vector<1x4x128xbf16>
    %36 = vector.shape_cast %35 : vector<1x4x128xbf16> to vector<4x128xbf16>
    %cst_21 = arith.constant dense<0.000000e+00> : vector<128x128xf32>
    %37 = tpu.matmul %34, %36, %cst_21 {dimension_numbers = #tpu.dot_dimension_numbers<[1], [0], [0], [1], [0, 0, 1, 1], [], []>} : vector<128x4xbf16>, vector<4x128xbf16>, vector<128x128xf32> -> vector<128x128xf32>
    %38 = arith.addf %32, %37 : vector<128x128xf32>
    %39 = vector.extract_strided_slice %1 {offsets = [2, 0, 0], sizes = [8, 16, 4], strides = [1, 1, 1]} : vector<10x18x4xbf16> to vector<8x16x4xbf16>
    %40 = vector.shape_cast %39 : vector<8x16x4xbf16> to vector<128x4xbf16>
    %c6 = arith.constant 6 : index
    %c0_22 = arith.constant 0 : index
    %c0_23 = arith.constant 0 : index
    %41 = vector.load %arg3[%c6, %c0_22, %c0_23] : memref<9x4x128xbf16, #tpu.memory_space<vmem>>, vector<1x4x128xbf16>
    %42 = vector.shape_cast %41 : vector<1x4x128xbf16> to vector<4x128xbf16>
    %cst_24 = arith.constant dense<0.000000e+00> : vector<128x128xf32>
    %43 = tpu.matmul %40, %42, %cst_24 {dimension_numbers = #tpu.dot_dimension_numbers<[1], [0], [0], [1], [0, 0, 1, 1], [], []>} : vector<128x4xbf16>, vector<4x128xbf16>, vector<128x128xf32> -> vector<128x128xf32>
    %44 = arith.addf %38, %43 : vector<128x128xf32>
    %45 = vector.extract_strided_slice %1 {offsets = [2, 1, 0], sizes = [8, 16, 4], strides = [1, 1, 1]} : vector<10x18x4xbf16> to vector<8x16x4xbf16>
    %46 = vector.shape_cast %45 : vector<8x16x4xbf16> to vector<128x4xbf16>
    %c7 = arith.constant 7 : index
    %c0_25 = arith.constant 0 : index
    %c0_26 = arith.constant 0 : index
    %47 = vector.load %arg3[%c7, %c0_25, %c0_26] : memref<9x4x128xbf16, #tpu.memory_space<vmem>>, vector<1x4x128xbf16>
    %48 = vector.shape_cast %47 : vector<1x4x128xbf16> to vector<4x128xbf16>
    %cst_27 = arith.constant dense<0.000000e+00> : vector<128x128xf32>
    %49 = tpu.matmul %46, %48, %cst_27 {dimension_numbers = #tpu.dot_dimension_numbers<[1], [0], [0], [1], [0, 0, 1, 1], [], []>} : vector<128x4xbf16>, vector<4x128xbf16>, vector<128x128xf32> -> vector<128x128xf32>
    %50 = arith.addf %44, %49 : vector<128x128xf32>
    %51 = vector.extract_strided_slice %1 {offsets = [2, 2, 0], sizes = [8, 16, 4], strides = [1, 1, 1]} : vector<10x18x4xbf16> to vector<8x16x4xbf16>
    %52 = vector.shape_cast %51 : vector<8x16x4xbf16> to vector<128x4xbf16>
    %c8 = arith.constant 8 : index
    %c0_28 = arith.constant 0 : index
    %c0_29 = arith.constant 0 : index
    %53 = vector.load %arg3[%c8, %c0_28, %c0_29] : memref<9x4x128xbf16, #tpu.memory_space<vmem>>, vector<1x4x128xbf16>
    %54 = vector.shape_cast %53 : vector<1x4x128xbf16> to vector<4x128xbf16>
    %cst_30 = arith.constant dense<0.000000e+00> : vector<128x128xf32>
    %55 = tpu.matmul %52, %54, %cst_30 {dimension_numbers = #tpu.dot_dimension_numbers<[1], [0], [0], [1], [0, 0, 1, 1], [], []>} : vector<128x4xbf16>, vector<4x128xbf16>, vector<128x128xf32> -> vector<128x128xf32>
    %56 = arith.addf %50, %55 : vector<128x128xf32>
    %c0_31 = arith.constant 0 : index
    %c0_32 = arith.constant 0 : index
    %57 = vector.load %arg4[%c0_31, %c0_32] : memref<1x128xf32, #tpu.memory_space<vmem>>, vector<1x128xf32>
    %58 = vector.broadcast %57 : vector<1x128xf32> to vector<128x128xf32>
    %59 = arith.addf %56, %58 : vector<128x128xf32>
    %cst_33 = arith.constant 0.000000e+00 : f32
    %60 = vector.broadcast %cst_33 : f32 to vector<128x128xf32>
    %61 = arith.maximumf %59, %60 : vector<128x128xf32>
    %62 = vector.shape_cast %61 : vector<128x128xf32> to vector<1x128x128xf32>
    %63 = arith.truncf %62 : vector<1x128x128xf32> to vector<1x128x128xbf16>
    %c0_34 = arith.constant 0 : index
    %c0_35 = arith.constant 0 : index
    %c0_36 = arith.constant 0 : index
    %64 = vector.load %arg5[%c0_34, %c0_35, %c0_36] : memref<1x128x128xbf16, #tpu.memory_space<vmem>>, vector<1x128x128xbf16>
    tpu.vector_store %arg5[%c0_34, %c0_35, %c0_36], %63 {strides = array<i32>} : memref<1x128x128xbf16, #tpu.memory_space<vmem>>, vector<1x128x128xbf16>,
    return
  }
  func.func @transform_0(%arg0: i32, %arg1: i32) -> (i32, i32, i32, i32) {
    %c2_i32 = arith.constant 2 : i32
    %0 = arith.muli %arg0, %c2_i32 : i32
    %1 = arith.addi %0, %arg1 : i32
    %c0_i32 = arith.constant 0 : i32
    %c0_i32_0 = arith.constant 0 : i32
    %c0_i32_1 = arith.constant 0 : i32
    %c0_i32_2 = arith.constant 0 : i32
    return %1, %c0_i32, %c0_i32_0, %c0_i32_1 : i32, i32, i32, i32
  }
  func.func @transform_1(%arg0: i32, %arg1: i32) -> (i32, i32, i32) {
    %c0_i32 = arith.constant 0 : i32
    %c0_i32_0 = arith.constant 0 : i32
    %c0_i32_1 = arith.constant 0 : i32
    %c0_i32_2 = arith.constant 0 : i32
    return %c0_i32, %c0_i32_0, %c0_i32_1 : i32, i32, i32
  }
  func.func @transform_2(%arg0: i32, %arg1: i32) -> (i32, i32) {
    %c0_i32 = arith.constant 0 : i32
    %c0_i32_0 = arith.constant 0 : i32
    %c0_i32_1 = arith.constant 0 : i32
    return %c0_i32, %c0_i32_0 : i32, i32
  }
  func.func @transform_3(%arg0: i32, %arg1: i32) -> (i32, i32, i32) {
    %c2_i32 = arith.constant 2 : i32
    %0 = arith.muli %arg0, %c2_i32 : i32
    %1 = arith.addi %0, %arg1 : i32
    %c0_i32 = arith.constant 0 : i32
    %c0_i32_0 = arith.constant 0 : i32
    %c0_i32_1 = arith.constant 0 : i32
    return %1, %c0_i32, %c0_i32_0 : i32, i32, i32
  }
}

</mosaic_0001>

<bundles_post_ra>
// kernel: tpu_custom_call.1
= control target key start
LH: loop header
LB: loop body
LE: loop exit
PB: predicated region body
PF: predicated region fallthrough
CT: control target
= control target key end

     0   :  { %8 = vsyncpa [#allocation3], 0  ;;  %s2644_s0 = inlined_call_operand.vmem [shape: bf16[4,10,18,4], index: 0, kind: input, shape index: {}]   ;;  %s2645_s1 = inlined_call_operand.vmem [shape: bf16[9,4,128], index: 1, kind: input, shape index: {}]   ;;  %s2646_s2 = inlined_call_operand.vmem [shape: f32[1,128], index: 2, kind: input, shape index: {}]   ;;  %s2647_s3 = inlined_call_operand.hbm [shape: bf16[4,128,128], index: 3, kind: output, shape index: {}]  }
   0x1   :  { %10 = vsyncpa [#allocation3 + $0x1], 0  ;;  %s1920_s12 = smov 0   ;;  %s1922_s13 = smov 0  }
   0x2   :  { %s1924_s14 = smov 0   ;;  %s1926_s15 = smov 0  }
   0x3   :  { %s1928_s16 = smov 0   ;;  %s1930_s17 = smov 0  }
   0x4   :  { %s1932_s18 = smov 0   ;;  %s1934_s19 = smov 0  }
   0x5 LB: > { %s1518_s20 = sadd.s32 4294967295, %s1896_s19   ;;  %s25_s21 = sadd.s32 1, %s1888_s17  ;;  %s1896_s19 = sphi %s1934_s19, %s16_s19   ;;  %s1892_s18 = sphi %s1932_s18, %s2660_s18   ;;  %s1888_s17 = sphi %s1930_s17, %s2659_s17   ;;  %s1884_s16 = sphi %s1928_s16, %s2658_s16   ;;  %s1880_s15 = sphi %s1926_s15, %s2657_s15   ;;  %s1876_s14 = sphi %s1924_s14, %s2656_s14   ;;  %s1872_s13 = sphi %s1922_s13, %s2655_s13   ;;  %s1868_s12 = sphi %s1920_s12, %s2654_s12  }
   0x6   : > { %s28_s22 = sadd.s32 1, %s1892_s18  ;;  %p26_p0 = scmp.ge.s32.totalorder %s25_s21, 2 }
   0x7   : > { %s1522_s23 = sshll.u32 %s1892_s18, 1  ;;  %s1519_s24 = sadd.s32 4294967294, %s1896_s19  }
   0x8   : > { %s105_s25 = sadd.s32 %s1888_s17, %s1522_s23  ;;  %s2662_s21 = smov (%p26_p0, %s25_s21), 0 }
   0x9   : > { %s2664_s22 = smov (!%p26_p0, %s28_s22), %s1892_s18  ;;  %p121_p1 = scmp.ne.s32.totalorder %s1876_s14, %s1872_s13 }
   0xa   : > { %p122_p2 = scmp.eq.s32.totalorder %s1518_s20, 3  ;;  %p30_p3 = scmp.ge.s32.totalorder %s2664_s22, 2 }
   0xb   : > { %p127_p4 = scmp.ne.s32.totalorder %s1872_s13, %s1868_s12  ;;  %p128_p6 = scmp.eq.s32.totalorder %s1519_s24, 3 }
   0xc   : > { %p1973_p5 = por %p122_p2, %p121_p1  ;;  %s2666_s22 = smov (%p30_p3, %s2664_s22), 0 }
   0xd   : > { %p1979_p7 = por %p128_p6, %p127_p4  ;;  %p1526_p8 = scmp.ge.s32.totalorder %s1896_s19, 1 }
   0xe   : > { %s1523_s28 = sshll.u32 %s2666_s22, 1  ;;  %p164_p9 = scmp.lt.s32.totalorder %s1896_s19, 5 }
   0xf   : > { %s107_s29 = sadd.s32 %s1523_s28, %s2662_s21  ;;  %s111_s30 = sadd.s32 1, %s1876_s14 }
  0x10   : > { %s108_s4 = ssub.s32 %s105_s25, %s107_s29  ;;  %p165_p10 = pnand %p1526_p8, %p164_p9 }
  0x11   : > { %p109_p11 = scmp.eq.s32.totalorder %s108_s4, 0  ;;  %s1528_s8 = sshll.u32 (!%p165_p10), %s1884_s16, 1 }
  0x12   : > { %168 = sbr.rel (%p165_p10) target bundleno = 480 (0x1e0), region = 32  ;;  %s1997_s9 = sadd.s32 (!%p165_p10), %s1880_s15, %s1528_s8 }
  0x13   : > { %s1989_s5 = scalar_select %p109_p11, %s1876_s14, %s111_s30  }
  0x14   : > { %p192_p12 = scmp.lt.s32.totalorder (!%p165_p10), %s1997_s9, 3  ;;  %s187_s28 = sand.u32 (!%p165_p10), 1, %s1872_s13  }
  0x15   : > { %s1676_s4 = sshll.u32 (!%p165_p10), %s1997_s9, 6  ;;  %s1822_s24 = scalar_lea.hbm (!%p165_p10), %s2647_s3, 256 }
  0x16   : > { %s1439_s8 = scalar_lea.hbm (!%p165_p10), %s2647_s3, %s1676_s4 }
  0x17   : > { %v1530_v0 = vld [vmem:[%s2645_s1 + $0x2] sm:$0x3]  ;;  %vm479_vm0 = vcmask 1041408   ;;  %v1587_v2 = vld [vmem:[%s2645_s1 + $0x4] sm:$0x3]  ;;  %s193_s20 = scalar_select %p192_p12, %s1997_s9, 3 }
  0x18   : > { %v481_v1 = vsel %vm479_vm0, %v1530_v0, 0  ;;  %v766_v3 = vsel %vm479_vm0, %v1587_v2, 0  ;;  %v1596_v4 = vld [vmem:[%s2645_s1 + $0x6] sm:$0x3]  ;;  %v232_v5 = vld [vmem:[%s2645_s1] sm:$0x3] }
  0x19   : > { %1724 = vmatpush.bf16.msra.mxu1 %v481_v1  ;;  %1725 = vmatpush.bf16.msra.mxu2 %v481_v1  ;;  %v1609_v6 = vld [vmem:[%s2645_s1 + $0x8] sm:$0x3]  ;;  %s1727_s29 = smul.u32 120, %s193_s20  ;;  %v844_v7 = vsel %vm479_vm0, %v1596_v4, 0  ;;  %v597_v8 = vsel %vm479_vm0, %v232_v5, 0  ;;  %vm454_vm3 = vcmask 31744  }
  0x1a   : > { %1726 = vmatpush.bf16.msra.mxu3 %v481_v1  ;;  %490 = vmatpush.bf16.msra.mxu0 %v481_v1  ;;  %v944_v9 = vsel %vm479_vm0, %v1609_v6, 0  ;;  %vm233_vm1 = vsmask.f32 3328  ;;  %vm234_vm2 = vsmask.f32 7440  ;;  %vm656_vm5 = vcmask 1042432  }
  0x1b   : > { %s2020_s6 = scalar_lea.vmem %s2644_s0, %s1727_s29  ;;  %vm2058_vm4 = vmor %vm233_vm1, %vm234_vm2  ;;  %vm657_vm6 = vcmask 1046532   ;;  %s1527_s29 = sshll.u32 %s187_s28, 6 }
  0x1c   : > { %v2023_v10 = vld [vmem:[%s2020_s6 + $0x18] sm:$0xf]  ;;  %v2026_v11 = vld [vmem:[%s2020_s6 + $0x1c] sm:$0xf]  ;;  %v2029_v12 = vld [vmem:[%s2020_s6 + $0x20] sm:$0x1] }
  0x1d   : > { %775 = vmatpush.bf16.msrb.mxu2 %v766_v3  ;;  %606 = vmatpush.bf16.msrb.mxu1 %v597_v8  ;;  %v285_v13 = vshrl.u32 %v2023_v10, 16  ;;  %v288_v14 = vshll.u32 %v2023_v10, 16  ;;  %v294_v15 = vshll.u32 %v2026_v11, 16  ;;  %v298_v16 = vshrl.u32 %v2026_v11, 16  ;;  %v2036_v17 = vld [vmem:[%s2020_s6 + $0x30] sm:$0xf]  ;;  %vm2212_vm7 = vmor %vm656_vm5, %vm657_vm6 }
  0x1e   : > { %853 = vmatpush.bf16.msrb.mxu3 %v844_v7  ;;  %953 = vmatpush.bf16.msrb.mxu0 %v944_v9  ;;  %v304_v18 = vshll.u32 %v2029_v12, 16  ;;  %v2040_v19 = vld [vmem:[%s2020_s6 + $0x34] sm:$0xf]  ;;  %v2043_v20 = vld [vmem:[%s2020_s6 + $0x38] sm:$0x1]  ;;  %v333_v21 = vshrl.u32 %v2036_v17, 16 }
  0x1f   : > { %v287_v22 = vrot.slane %v285_v13, 4  ;;  %v290_v23 = vrot.slane %v288_v14, 5  ;;  %v296_v24 = vrot.slane %v294_v15, 5  ;;  %v300_v25 = vrot.slane %v298_v16, 4  ;;  %v2047_v26 = vld [vmem:[%s2020_s6 + $0x48] sm:$0xf] }
  0x20   : > { %v306_v27 = vrot.slane %v304_v18, 5  ;;  %v335_v28 = vrot.slane %v333_v21, 4  ;;  %v336_v29 = vshll.u32 %v2036_v17, 16  ;;  %v342_v30 = vshll.u32 %v2040_v19, 16  ;;  %v2054_v35 = vld [vmem:[%s2020_s6 + $0x4c] sm:$0xf] }
  0x21   : > { %v291_v31 = vor.u32 %v290_v23, %v287_v22  ;;  %v301_v32 = vor.u32 %v300_v25, %v296_v24  ;;  %v346_v33 = vshrl.u32 %v2040_v19, 16  ;;  %v352_v34 = vshll.u32 %v2043_v20, 16  ;;  %v2065_v46 = vld [vmem:[%s2020_s6 + $0x50] sm:$0x1]  ;;  %v2074_v54 = vld [vmem:[%s2020_s6] sm:$0xf] }
  0x22   : > { %v338_v37 = vrot.slane %v336_v29, 5  ;;  %v344_v38 = vrot.slane %v342_v30, 5  ;;  %v381_v39 = vshrl.u32 %v2047_v26, 16  ;;  %v384_v40 = vshll.u32 %v2047_v26, 16  ;;  %v2082_v2 = vld [vmem:[%s2020_s6 + $0x4] sm:$0xf] }
  0x23   : > { %v292_v41 = vrot.slane %v291_v31, 4  ;;  %v302_v42 = vrot.slane %v301_v32, 4  ;;  %v348_v43 = vrot.slane %v346_v33, 4  ;;  %v354_v44 = vrot.slane %v352_v34, 5  ;;  %v2088_v8 = vld [vmem:[%s2020_s6 + $0x8] sm:$0x1] }
  0x24   : > { %v339_v45 = vor.u32 %v338_v37, %v335_v28  ;;  %v383_v47 = vrot.slane %v381_v39, 4  ;;  %v386_v48 = vrot.slane %v384_v40, 5  ;;  %v390_v49 = vshll.u32 %v2054_v35, 16  ;;  %v2096_v16 = vld [vmem:[%s2020_s6 + $0x24] sm:$0xf]  ;;  %s2562_s30 = scalar_lea.vmem [#allocation2], %s1527_s29 }
  0x25   : > { %v297_v50 = vsel %vm2058_vm4, %v292_v41, %v296_v24  ;;  %v307_v51 = vsel %vm2058_vm4, %v302_v42, %v306_v27  ;;  %v349_v52 = vor.u32 %v348_v43, %v344_v38  ;;  %v394_v53 = vshrl.u32 %v2054_v35, 16  ;;  %v2105_v29 = vld [vmem:[%s2020_s6 + $0x28] sm:$0xf]  ;;  %v2110_v33 = vld [vmem:[%s2020_s6 + $0x2c] sm:$0x1]  ;;  %s1440_s10 = sshll.u32 %s2562_s30, 4  ;;  %s1441_s10 = int_to_ptr.vmem [resolvable:$true] %s1440_s10 }
  0x26   : > { %v434_v55 = vunpack.c.l.b16 %v297_v50  ;;  %v435_v56 = vunpack.c.l.b16 %v307_v51  ;;  %v340_v57 = vrot.slane %v339_v45, 4  ;;  %v387_v58 = vor.u32 %v386_v48, %v383_v47  ;;  %v2117_v41 = vld [vmem:[%s2020_s6 + $0x3c] sm:$0xf]  ;;  %s1442_s11 = sshll.u32 %s1439_s8, 4  ;;  %s1426_s9 = scalar_lea.sflag [#allocation3], %s187_s28  ;;  %s1443_s11 = int_to_ptr.hbm [resolvable:$true] %s1442_s11 }
  0x27   : > { %v350_v59 = vrot.slane %v349_v52, 4  ;;  %v392_v60 = vrot.slane %v390_v49, 5  ;;  %v396_v61 = vrot.slane %v394_v53, 4  ;;  %v400_v62 = vshll.u32 %v2065_v46, 16  ;;  %s1816_s20 = sshra.s32 %s1443_s11, 4  ;;  %s1817_s20 = int_to_ptr.hbm [resolvable:$true] %s1816_s20 }
  0x28   : > { %v2077_v63 = vpack.c.b16 %v435_v56, %v434_v55  ;;  %v345_v0 = vsel %vm2058_vm4, %v340_v57, %v344_v38  ;;  %v388_v1 = vrot.slane %v387_v58, 4  ;;  %v237_v3 = vshrl.u32 %v2074_v54, 16  ;;  %v2125_v55 = vld [vmem:[%s2020_s6 + $0x40] sm:$0xf]  ;;  %s1818_s16 = scalar_lea.hbm %s1817_s20, 64  ;;  %p1823_p2 = scmp.lt.s32.totalorder %s1817_s20, %s2647_s3 }
  0x29   : > { %v355_v4 = vsel %vm2058_vm4, %v350_v59, %v354_v44  ;;  %v438_v5 = vunpack.c.l.b16 %v345_v0  ;;  %v397_v6 = vor.u32 %v396_v61, %v392_v60  ;;  %v402_v7 = vrot.slane %v400_v62, 5  ;;  %v2137_v62 = vld [vmem:[%s2020_s6 + $0x54] sm:$0xf]  ;;  %p1819_p13 = scmp.ne.s32.totalorder %s1817_s20, %s1818_s16  ;;  %p1824_p3 = scmp.lt.s32.totalorder %s1822_s24, %s1818_s16 }
  0x2a   : > { %1533 = vmatmul.msk.bf16.vlgmr.msra.gmra.mxu1 %vm454_vm3, %v2077_v63  ;;  %v439_v9 = vunpack.c.l.b16 %v355_v4  ;;  %v393_v13 = vsel %vm2058_vm4, %v388_v1, %v392_v60  ;;  %v239_v14 = vrot.slane %v237_v3, 4  ;;  %v240_v15 = vshll.u32 %v2074_v54, 16  ;;  %v2133_v60 = vld [vmem:[%s2020_s6 + $0x44] sm:$0x1] }
  0x2b   : > { %v398_v18 = vrot.slane %v397_v6, 4  ;;  %v442_v21 = vunpack.c.l.b16 %v393_v13  ;;  %v246_v22 = vshll.u32 %v2082_v2, 16  ;;  %v250_v23 = vshrl.u32 %v2082_v2, 16  ;;  %p1820_p0 = pnand %p1819_p13, %p1973_p5  ;;  %p1825_p4 = por %p1824_p3, %p1823_p2 }
  0x2c   : > { %v2100_v24 = vpack.c.b16 %v439_v9, %v438_v5  ;;  %v242_v25 = vrot.slane %v240_v15, 5  ;;  %v256_v27 = vshll.u32 %v2088_v8, 16  ;;  %v664_v28 = vrot.slane %v2088_v8, 5 }
  0x2d   : > { %v403_v30 = vsel %vm2058_vm4, %v398_v18, %v402_v7  ;;  %v248_v31 = vrot.slane %v246_v22, 5  ;;  %v252_v32 = vrot.slane %v250_v23, 4  ;;  %v309_v34 = vshrl.u32 %v2096_v16, 16  ;;  %p1821_p1 = pneg %p1820_p0 }
  0x2e   : > { %1535 = vmatmul.msk.bf16.vlgmr.msra.gmra.mxu2 %vm454_vm3, %v2100_v24  ;;  %v443_v37 = vunpack.c.l.b16 %v403_v30  ;;  %v243_v38 = vor.u32 %v242_v25, %v239_v14  ;;  %v258_v39 = vrot.slane %v256_v27, 5  ;;  %v312_v40 = vshll.u32 %v2096_v16, 16  ;;  %v2148_v27 = vld [vmem:[%s2020_s6 + $0x58] sm:$0xf]  ;;  %v2151_v30 = vld [vmem:[%s2020_s6 + $0x5c] sm:$0x1] }
  0x2f   : > { %v253_v42 = vor.u32 %v252_v32, %v248_v31  ;;  %v311_v43 = vrot.slane %v309_v34, 4  ;;  %v318_v44 = vshll.u32 %v2105_v29, 16  ;;  %v322_v45 = vshrl.u32 %v2105_v29, 16  ;;  %p1826_p6 = pnand %p1825_p4, %p1821_p1 }
  0x30   : > { %v2121_v47 = vpack.c.b16 %v443_v37, %v442_v21  ;;  %v244_v48 = vrot.slane %v243_v38, 4  ;;  %v314_v49 = vrot.slane %v312_v40, 5  ;;  %v328_v50 = vshll.u32 %v2110_v33, 16  ;;  %v2156_v38 = vld [vmem:[%s2020_s6 + $0xc] sm:$0xf] }
  0x31   : > { %v254_v51 = vrot.slane %v253_v42, 4  ;;  %v320_v52 = vrot.slane %v318_v44, 5  ;;  %v324_v53 = vrot.slane %v322_v45, 4  ;;  %v357_v56 = vshrl.u32 %v2117_v41, 16 }
  0x32   : > { %1537 = vmatmul.msk.bf16.vlgmr.msra.gmra.mxu3 %vm454_vm3, %v2121_v47  ;;  %v249_v57 = vsel %vm2058_vm4, %v244_v48, %v248_v31  ;;  %v315_v58 = vor.u32 %v314_v49, %v311_v43  ;;  %v330_v59 = vrot.slane %v328_v50, 5  ;;  %v360_v61 = vshll.u32 %v2117_v41, 16 }
  0x33   : > { %v259_v0 = vsel %vm2058_vm4, %v254_v51, %v258_v39  ;;  %v430_v1 = vunpack.c.l.b16 %v249_v57  ;;  %v325_v3 = vor.u32 %v324_v53, %v320_v52  ;;  %v359_v4 = vrot.slane %v357_v56, 4  ;;  %v2168_v53 = vld [vmem:[%s2020_s6 + $0x10] sm:$0xf] }
  0x34   : > { %v431_v5 = vunpack.c.l.b16 %v259_v0  ;;  %v316_v6 = vrot.slane %v315_v58, 4  ;;  %v362_v7 = vrot.slane %v360_v61, 5  ;;  %v366_v9 = vshll.u32 %v2125_v55, 16  ;;  %v2172_v0 = vld [vmem:[%s2020_s6 + $0x14] sm:$0x1] }
  0x35   : > { %v326_v13 = vrot.slane %v325_v3, 4  ;;  %v370_v14 = vshrl.u32 %v2125_v55, 16  ;;  %v376_v15 = vshll.u32 %v2133_v60, 16  ;;  %v405_v18 = vshrl.u32 %v2137_v62, 16 }
  0x36   : > { %v446_v21 = vpack.c.b16 %v431_v5, %v430_v1  ;;  %v321_v22 = vsel %vm2058_vm4, %v316_v6, %v320_v52  ;;  %v363_v23 = vor.u32 %v362_v7, %v359_v4  ;;  %v368_v25 = vrot.slane %v366_v9, 5 }
  0x37   : > { %v331_v31 = vsel %vm2058_vm4, %v326_v13, %v330_v59  ;;  %v436_v32 = vunpack.c.l.b16 %v321_v22  ;;  %v372_v34 = vrot.slane %v370_v14, 4  ;;  %v378_v37 = vrot.slane %v376_v15, 5 }
  0x38   : > { %1531 = vmatmul.msk.bf16.vlgmr.msra.gmra.mxu0 %vm454_vm3, %v446_v21  ;;  %v437_v39 = vunpack.c.l.b16 %v331_v31  ;;  %v364_v40 = vrot.slane %v363_v23, 4  ;;  %v407_v42 = vrot.slane %v405_v18, 4  ;;  %v408_v43 = vshll.u32 %v2137_v62, 16  ;;  %v1628_v31 = vld [vmem:[%s2645_s1 + $0xc] sm:$0x3] }
  0x39   : > { %v373_v44 = vor.u32 %v372_v34, %v368_v25  ;;  %v414_v45 = vshll.u32 %v2148_v27, 16  ;;  %v418_v48 = vshrl.u32 %v2148_v27, 16  ;;  %v424_v49 = vshll.u32 %v2151_v30, 16 }
  0x3a   : > { %v2163_v50 = vpack.c.b16 %v437_v39, %v436_v32  ;;  %v369_v51 = vsel %vm2058_vm4, %v364_v40, %v368_v25  ;;  %v410_v52 = vrot.slane %v408_v43, 5  ;;  %v261_v56 = vshrl.u32 %v2156_v38, 16  ;;  %v1641_v40 = vld [vmem:[%s2645_s1 + $0xe] sm:$0x3] }
  0x3b   : > { %v374_v57 = vrot.slane %v373_v44, 4  ;;  %v440_v58 = vunpack.c.l.b16 %v369_v51  ;;  %v416_v59 = vrot.slane %v414_v45, 5  ;;  %v420_v61 = vrot.slane %v418_v48, 4 }
  0x3c   : > { %1534 = vmatmul.msk.bf16.gmra.mxu1 %vm454_vm3, %v2163_v50  ;;  %v411_v1 = vor.u32 %v410_v52, %v407_v42  ;;  %v426_v3 = vrot.slane %v424_v49, 5  ;;  %v263_v4 = vrot.slane %v261_v56, 4  ;;  %v264_v5 = vshll.u32 %v2156_v38, 16  ;;  %v1619_v42 = vld [vmem:[%s2645_s1 + $0xa] sm:$0x3] }
  0x3d   : > { %v379_v6 = vsel %vm2058_vm4, %v374_v57, %v378_v37  ;;  %v421_v7 = vor.u32 %v420_v61, %v416_v59  ;;  %v270_v9 = vshll.u32 %v2168_v53, 16  ;;  %v274_v13 = vshrl.u32 %v2168_v53, 16  ;;  %v1651_v56 = vld [vmem:[%s2645_s1 + $0x10] sm:$0x3] }
  0x3e   : > { %v441_v14 = vunpack.c.l.b16 %v379_v6  ;;  %v412_v15 = vrot.slane %v411_v1, 4  ;;  %v266_v18 = vrot.slane %v264_v5, 5  ;;  %v280_v21 = vshll.u32 %v2172_v0, 16 }
  0x3f   : > { %v422_v22 = vrot.slane %v421_v7, 4  ;;  %v272_v23 = vrot.slane %v270_v9, 5  ;;  %v276_v25 = vrot.slane %v274_v13, 4  ;;  %v1579_v51 = vrot.slane %v2074_v54, 9 }
  0x40   : > { %v2185_v32 = vpack.c.b16 %v441_v14, %v440_v58  ;;  %v417_v34 = vsel %vm2058_vm4, %v412_v15, %v416_v59  ;;  %v267_v37 = vor.u32 %v266_v18, %v263_v4  ;;  %v282_v39 = vrot.slane %v280_v21, 5  ;;  %v1666_v15 = vld [vmem:[%s2020_s6] sm:$0xff] }
  0x41   : > { %v427_v43 = vsel %vm2058_vm4, %v422_v22, %v426_v3  ;;  %v444_v44 = vunpack.c.l.b16 %v417_v34  ;;  %v277_v45 = vor.u32 %v276_v25, %v272_v23  ;;  %v661_v52 = vrot.slane %v2082_v2, 5 }
  0x42   : > { %1536 = vmatmul.msk.bf16.gmra.mxu2 %vm454_vm3, %v2185_v32  ;;  %v445_v48 = vunpack.c.l.b16 %v427_v43  ;;  %v268_v49 = vrot.slane %v267_v37, 4  ;;  %v1106_v58 = vsel %vm479_vm0, %v1628_v31, 0  ;;  %v1206_v59 = vsel %vm479_vm0, %v1641_v40, 0 }
  0x43   : > { %v278_v57 = vrot.slane %v277_v45, 4  ;;  %v1028_v61 = vsel %vm479_vm0, %v1619_v42, 0  ;;  %v663_v2 = vrot.slane %v661_v52, 4  ;;  %1115 = vmatpush.bf16.msra.mxu2 %v1106_v58  ;;  %1215 = vmatpush.bf16.msra.mxu3 %v1206_v59  ;;  %v1290_v6 = vsel %vm479_vm0, %v1651_v56, 0  ;;  %v1667_v42 = vld [vmem:[%s2020_s6 + $0xc] sm:$0xff] }
  0x44   : > { %v2207_v1 = vpack.c.b16 %v445_v48, %v444_v44  ;;  %v273_v3 = vsel %vm2058_vm4, %v268_v49, %v272_v23  ;;  %1037 = vmatpush.bf16.msra.mxu1 %v1028_v61  ;;  %1299 = vmatpush.bf16.msra.mxu0 %v1290_v6  ;;  %v662_v9 = vsel %vm2212_vm7, %v1579_v51, %v661_v52  ;;  %v1581_v22 = vrot.slane %v2023_v10, 9 }
  0x45   : > { %v283_v4 = vsel %vm2058_vm4, %v278_v57, %v282_v39  ;;  %v432_v5 = vunpack.c.l.b16 %v273_v3  ;;  %v665_v13 = vsel %vm2212_vm7, %v663_v2, %v664_v28  ;;  %v717_v18 = vunpack.c.l.b16 %v662_v9  ;;  %v2288_v3 = vld [vmem:[%s2020_s6 + $0x30] sm:$0xff] }
  0x46   : > { %1538 = vmatmul.msk.bf16.gmra.mxu3 %vm454_vm3, %v2207_v1  ;;  %v433_v7 = vunpack.c.l.b16 %v283_v4  ;;  %v718_v21 = vunpack.c.l.b16 %v665_v13  ;;  %v675_v23 = vrot.slane %v2026_v11, 5  ;;  %v678_v25 = vrot.slane %v2029_v12, 5  ;;  %v2308_v13 = vld [vmem:[%s2020_s6 + $0x3c] sm:$0xff] }
  0x47   : > { %v668_v34 = vrot.slane %v2168_v53, 5  ;;  %v1580_v10 = vrot.slane %v2156_v38, 9  ;;  %v671_v12 = vrot.slane %v2172_v0, 5  ;;  %v1582_v38 = vrot.slane %v2096_v16, 9  ;;  %v2263_v16 = vld [vmem:[%s2020_s6 + $0x18] sm:$0xff] }
  0x48   : > { %v447_v14 = vpack.c.b16 %v433_v7, %v432_v5  ;;  %v733_v31 = vpack.c.b16 %v718_v21, %v717_v18  ;;  %v676_v8 = vsel %vm2212_vm7, %v1581_v22, %v675_v23  ;;  %v677_v28 = vrot.slane %v675_v23, 4 }
  0x49   : > { %v721_v37 = vunpack.c.l.b16 %v676_v8  ;;  %v670_v11 = vrot.slane %v668_v34, 4  ;;  %v669_v53 = vsel %vm2212_vm7, %v1580_v10, %v668_v34  ;;  %v682_v0 = vrot.slane %v2105_v29, 5 }
  0x4a   : > { %1532 = vmatmul.msk.bf16.gmra.mxu0 %vm454_vm3, %v447_v14  ;;  %v679_v39 = vsel %vm2212_vm7, %v677_v28, %v678_v25  ;;  %v719_v45 = vunpack.c.l.b16 %v669_v53  ;;  %v685_v49 = vrot.slane %v2110_v33, 5  ;;  %v2276_v33 = vld [vmem:[%s2020_s6 + $0x24] sm:$0xff]  ;;  %v689_v61 = vrot.slane %v2040_v19, 5 }
  0x4b   : > { %v722_v40 = vunpack.c.l.b16 %v679_v39  ;;  %v672_v44 = vsel %vm2212_vm7, %v670_v11, %v671_v12  ;;  %v683_v52 = vsel %vm2212_vm7, %v1582_v38, %v682_v0  ;;  %v684_v56 = vrot.slane %v682_v0, 4  ;;  %v2328_v25 = vld [vmem:[%s2020_s6 + $0x48] sm:$0xff]  ;;  %v2364_v38 = vld [vmem:[%s2020_s6 + $0x54] sm:$0xff] }
  0x4c   : > { %1571 = vmatmul.msk.bf16.vlgmr.msrb.gmra.mxu1 %vm454_vm3, %v1666_v15  ;;  %v720_v48 = vunpack.c.l.b16 %v672_v44  ;;  %v723_v57 = vunpack.c.l.b16 %v683_v52  ;;  %v1583_v2 = vrot.slane %v2036_v17, 9  ;;  %v691_v4 = vrot.slane %v689_v61, 4 }
  0x4d   : > { %v2242_v43 = vpack.c.b16 %v722_v40, %v721_v37  ;;  %v686_v58 = vsel %vm2212_vm7, %v684_v56, %v685_v49  ;;  %v692_v5 = vrot.slane %v2043_v20, 5  ;;  %v696_v20 = vrot.slane %v2125_v55, 5  ;;  %v2343_v40 = vld [vmem:[%s2020_s6 + $0x60] sm:$0xf] }
  0x4e   : > { %v2254_v51 = vpack.c.b16 %v720_v48, %v719_v45  ;;  %v724_v59 = vunpack.c.l.b16 %v686_v58  ;;  %v690_v6 = vsel %vm2212_vm7, %v1583_v2, %v689_v61  ;;  %v699_v18 = vrot.slane %v2133_v60, 5  ;;  %v2369_v61 = vld [vmem:[%s2020_s6 + $0x68] sm:$0x1] }
  0x4f   : > { %v693_v19 = vsel %vm2212_vm7, %v691_v4, %v692_v5  ;;  %v725_v7 = vunpack.c.l.b16 %v690_v6  ;;  %v698_v15 = vrot.slane %v696_v20, 4  ;;  %v703_v60 = vrot.slane %v2054_v35, 5 }
  0x50   : > { %v2265_v29 = vpack.c.b16 %v724_v59, %v723_v57  ;;  %v726_v9 = vunpack.c.l.b16 %v693_v19  ;;  %v706_v28 = vrot.slane %v2065_v46, 5  ;;  %v2346_v46 = vld [vmem:[%s2020_s6 + $0x64] sm:$0xf]  ;;  %v912_v10 = vshrl.u32 %v2343_v40, 16 }
  0x51   : > { %v700_v55 = vsel %vm2212_vm7, %v698_v15, %v699_v18  ;;  %v705_v8 = vrot.slane %v703_v60, 4  ;;  %v915_v11 = vshll.u32 %v2343_v40, 16  ;;  %v921_v12 = vshll.u32 %v2346_v46, 16 }
  0x52   : > { %1588 = vmatmul.msk.bf16.vlgmr.msrb.gmra.mxu2 %vm454_vm3, %v733_v31  ;;  %v2302_v17 = vpack.c.b16 %v726_v9, %v725_v7  ;;  %v728_v23 = vunpack.c.l.b16 %v700_v55  ;;  %v1585_v31 = vrot.slane %v2047_v26, 9  ;;  %v710_v44 = vrot.slane %v2148_v27, 5 }
  0x53   : > { %v707_v35 = vsel %vm2212_vm7, %v705_v8, %v706_v28  ;;  %v925_v45 = vshrl.u32 %v2346_v46, 16  ;;  %v914_v0 = vrot.slane %v912_v10, 4  ;;  %v917_v49 = vrot.slane %v915_v11, 5  ;;  %v2401_v8 = vld [vmem:[%s2020_s6 + $0x60] sm:$0xff] }
  0x54   : > { %v704_v37 = vsel %vm2212_vm7, %v1585_v31, %v703_v60  ;;  %v730_v26 = vunpack.c.l.b16 %v707_v35  ;;  %v923_v52 = vrot.slane %v921_v12, 5  ;;  %v1586_v56 = vrot.slane %v2137_v62, 9 }
  0x55   : > { %v729_v39 = vunpack.c.l.b16 %v704_v37  ;;  %v712_v57 = vrot.slane %v710_v44, 4  ;;  %v713_v58 = vrot.slane %v2151_v30, 5  ;;  %v927_v59 = vrot.slane %v925_v45, 4 }
  0x56   : > { %1601 = vmatmul.msk.bf16.vlgmr.msrb.gmra.mxu3 %vm454_vm3, %v1667_v42  ;;  %v918_v4 = vor.u32 %v917_v49, %v914_v0  ;;  %v711_v5 = vsel %vm2212_vm7, %v1586_v56, %v710_v44  ;;  %v931_v19 = vshll.u32 %v2369_v61, 16 }
  0x57   : > { %v714_v6 = vsel %vm2212_vm7, %v712_v57, %v713_v58  ;;  %v928_v62 = vor.u32 %v927_v59, %v923_v52  ;;  %v731_v7 = vunpack.c.l.b16 %v711_v5 }
  0x58   : > { %v732_v9 = vunpack.c.l.b16 %v714_v6  ;;  %v933_v18 = vrot.slane %v931_v19, 5 }
  0x59   : > { %v929_v15 = vrot.slane %v928_v62, 4 }
  0x5a   : > { %1610 = vmatmul.msk.bf16.vlgmr.msrb.gmra.mxu0 %vm454_vm3, %v447_v14  ;;  %v1584_v14 = vrot.slane %v2117_v41, 9  ;;  %v2388_v55 = vpack.c.b16 %v732_v9, %v731_v7 }
  0x5b   : > { %v934_v60 = vsel %vm2058_vm4, %v929_v15, %v933_v18 }
  0x5c   : > { %1572 = vmatmul.msk.bf16.gmra.mxu1 %vm454_vm3, %v1667_v42  ;;  %v697_v21 = vsel %vm2212_vm7, %v1584_v14, %v696_v20  ;;  %v2350_v42 = vpack.c.b16 %v730_v26, %v729_v39  ;;  %v919_v14 = vrot.slane %v918_v4, 4  ;;  %v938_v37 = vunpack.c.l.b16 %v934_v60 }
  0x5d   : > { %v727_v22 = vunpack.c.l.b16 %v697_v21 }
  0x5f   : > { %v2322_v41 = vpack.c.b16 %v728_v23, %v727_v22  ;;  %v924_v23 = vsel %vm2058_vm4, %v919_v14, %v923_v52 }
  0x60   : > { %v937_v28 = vunpack.c.l.b16 %v924_v23 }
  0x62   : > { %1589 = vmatmul.msk.bf16.gmra.mxu2 %vm454_vm3, %v2254_v51  ;;  %v2407_v39 = vpack.c.b16 %v938_v37, %v937_v28 }
  0x66   : > { %1602 = vmatmul.msk.bf16.gmra.mxu3 %vm454_vm3, %v2263_v16 }
  0x6a   : > { %1611 = vmatmul.msk.bf16.gmra.mxu0 %vm454_vm3, %v2077_v63 }
  0x6c   : > { %1573 = vmatmul.msk.bf16.gmra.mxu1 %vm454_vm3, %v2263_v16 }
  0x72   : > { %1590 = vmatmul.msk.bf16.gmra.mxu2 %vm454_vm3, %v2242_v43 }
  0x76   : > { %1603 = vmatmul.msk.bf16.gmra.mxu3 %vm454_vm3, %v2276_v33 }
  0x7a   : > { %1612 = vmatmul.msk.bf16.gmra.mxu0 %vm454_vm3, %v2163_v50 }
  0x7c   : > { %1574 = vmatmul.msk.bf16.gmra.mxu1 %vm454_vm3, %v2276_v33 }
  0x82   : > { %1591 = vmatmul.msk.bf16.gmra.mxu2 %vm454_vm3, %v2265_v29 }
  0x86   : > { %1604 = vmatmul.msk.bf16.gmra.mxu3 %vm454_vm3, %v2288_v3 }
  0x8a   : > { %1613 = vmatmul.msk.bf16.gmra.mxu0 %vm454_vm3, %v2100_v24 }
  0x8c   : > { %1575 = vmatmul.msk.bf16.gmra.mxu1 %vm454_vm3, %v2288_v3 }
  0x92   : > { %1592 = vmatmul.msk.bf16.gmra.mxu2 %vm454_vm3, %v2302_v17 }
  0x96   : > { %1605 = vmatmul.msk.bf16.gmra.mxu3 %vm454_vm3, %v2308_v13 }
  0x9a   : > { %1614 = vmatmul.msk.bf16.gmra.mxu0 %vm454_vm3, %v2185_v32 }
  0x9c   : > { %1576 = vmatmul.msk.bf16.gmra.mxu1 %vm454_vm3, %v2308_v13 }
  0xa2   : > { %1593 = vmatmul.msk.bf16.gmra.mxu2 %vm454_vm3, %v2322_v41 }
  0xa6   : > { %1606 = vmatmul.msk.bf16.gmra.mxu3 %vm454_vm3, %v2328_v25 }
  0xa7   : > { %v2334_v34 = vpop.f32.mrf.mxu1 }
  0xaa   : > { %1615 = vmatmul.msk.bf16.gmra.mxu0 %vm454_vm3, %v2121_v47 }
  0xac   : > { %1577 = vmatmul.msk.bf16.gmra.mxu1 %vm454_vm3, %v2328_v25 }
  0xaf   : > { %v2355_v53 = vpop.f32.mrf.mxu1 }
  0xb1   : > { %v2359_v48 = vpop.f32.mrf.mxu2 }
  0xb2   : > { %1594 = vmatmul.msk.bf16.gmra.mxu2 %vm454_vm3, %v2350_v42 }
  0xb5   : > { %v492_v27 = vpop.f32.mrf.mxu0  ;;  %v2371_v2 = vpop.f32.mrf.mxu3 }
  0xb6   : > { %1607 = vmatmul.msk.bf16.gmra.mxu3 %vm454_vm3, %v2364_v38 }
  0xb9   : > { %v2380_v30 = vpop.f32.mrf.mxu1  ;;  %v2384_v20 = vpop.f32.mrf.mxu2 }
  0xba   : > { %1616 = vmatmul.msk.bf16.gmra.mxu0 %vm454_vm3, %v2207_v1 }
  0xbc   : > { %1578 = vmatmul.msk.bf16.gmra.mxu1 %vm454_vm3, %v2364_v38 }
  0xbd   : > { %v494_v21 = vpop.f32.mrf.mxu0  ;;  %v2390_v22 = vpop.f32.mrf.mxu3 }
  0xc1   : > { %v2396_v31 = vpop.f32.mrf.mxu1 }
  0xc2   : > { %1595 = vmatmul.msk.bf16.gmra.mxu2 %vm454_vm3, %v2388_v55 }
  0xc5   : > { %v2403_v35 = vpop.f32.mrf.mxu2 }
  0xc6   : > { %1608 = vmatmul.msk.bf16.gmra.mxu3 %vm454_vm3, %v2401_v8 }
  0xc7   : > { %v497_v26 = vpop.f32.mrf.mxu0 }
  0xc9   : > { %v2409_v10 = vpop.f32.mrf.mxu3  ;;  %v608_v11 = vpop.f32.mrf.mxu1 }
  0xca   : > { %1617 = vmatmul.msk.bf16.gmra.mxu0 %vm454_vm3, %v2407_v39  ;;  %v609_v12 = vadd.f32 %v608_v11, %v492_v27 }
  0xcc   : > { %1620 = vmatmul.msk.bf16.vlgmr.msra.gmra.mxu1 %vm454_vm3, %v2254_v51 }
  0xcd   : > { %v2415_v44 = vpop.f32.mrf.mxu2 }
  0xcf   : > { %v499_v45 = vpop.f32.mrf.mxu0 }
  0xd1   : > { %v2417_v0 = vpop.f32.mrf.mxu3  ;;  %v610_v49 = vpop.f32.mrf.mxu1 }
  0xd2   : > { %1633 = vmatmul.msk.bf16.vlgmr.msra.gmra.mxu2 %vm454_vm3, %v2263_v16  ;;  %v611_v52 = vadd.f32 %v610_v49, %v494_v21 }
  0xd5   : > { %v777_v56 = vpop.f32.mrf.mxu2 }
  0xd6   : > { %1642 = vmatmul.msk.bf16.vlgmr.msra.gmra.mxu3 %vm454_vm3, %v2077_v63  ;;  %v817_v57 = vadd.f32 %v777_v56, %v609_v12 }
  0xd7   : > { %v955_v58 = vpop.f32.mrf.mxu0 }
  0xd9   : > { %v855_v59 = vpop.f32.mrf.mxu3  ;;  %v613_v27 = vpop.f32.mrf.mxu1 }
  0xda   : > { %1652 = vmatmul.msk.bf16.vlgmr.msra.gmra.mxu0 %vm454_vm3, %v2242_v43  ;;  %v895_v51 = vadd.f32 %v855_v59, %v817_v57  ;;  %v614_v4 = vadd.f32 %v613_v27, %v497_v26 }
  0xdc   : > { %1621 = vmatmul.msk.bf16.gmra.mxu1 %vm454_vm3, %v2242_v43  ;;  %v2427_v5 = vadd.f32 %v955_v58, %v895_v51 }
  0xdd   : > { %v779_v16 = vpop.f32.mrf.mxu2 }
  0xde   : > { %v818_v6 = vadd.f32 %v779_v16, %v611_v52 }
  0xdf   : > { %v957_v62 = vpop.f32.mrf.mxu0 }
  0xe1   : > { %v857_v19 = vpop.f32.mrf.mxu3  ;;  %v615_v7 = vpop.f32.mrf.mxu1 }
  0xe2   : > { %v896_v63 = vadd.f32 %v857_v19, %v818_v6  ;;  %1634 = vmatmul.msk.bf16.gmra.mxu2 %vm454_vm3, %v2276_v33  ;;  %v616_v9 = vadd.f32 %v615_v7, %v499_v45 }
  0xe4   : > { %v2431_v14 = vadd.f32 %v957_v62, %v896_v63 }
  0xe5   : > { %v782_v15 = vpop.f32.mrf.mxu2 }
  0xe6   : > { %1643 = vmatmul.msk.bf16.gmra.mxu3 %vm454_vm3, %v2163_v50  ;;  %v819_v18 = vadd.f32 %v782_v15, %v614_v4 }
  0xe7   : > { %v960_v43 = vpop.f32.mrf.mxu0 }
  0xe9   : > { %v860_v21 = vpop.f32.mrf.mxu3  ;;  %v618_v23 = vpop.f32.mrf.mxu1 }
  0xea   : > { %1653 = vmatmul.msk.bf16.gmra.mxu0 %vm454_vm3, %v2265_v29  ;;  %v897_v60 = vadd.f32 %v860_v21, %v819_v18  ;;  %v619_v28 = vadd.f32 %v618_v23, %v2334_v34 }
  0xec   : > { %1622 = vmatmul.msk.bf16.gmra.mxu1 %vm454_vm3, %v2265_v29  ;;  %v2440_v33 = vadd.f32 %v960_v43, %v897_v60 }
  0xed   : > { %v784_v37 = vpop.f32.mrf.mxu2 }
  0xee   : > { %v820_v26 = vadd.f32 %v784_v37, %v616_v9 }
  0xef   : > { %v962_v11 = vpop.f32.mrf.mxu0 }
  0xf1   : > { %v862_v12 = vpop.f32.mrf.mxu3  ;;  %v620_v50 = vpop.f32.mrf.mxu1 }
  0xf2   : > { %v898_v45 = vadd.f32 %v862_v12, %v820_v26  ;;  %1635 = vmatmul.msk.bf16.gmra.mxu2 %vm454_vm3, %v2288_v3  ;;  %v621_v49 = vadd.f32 %v620_v50, %v2355_v53 }
  0xf4   : > { %v2445_v52 = vadd.f32 %v962_v11, %v898_v45 }
  0xf5   : > { %v787_v56 = vpop.f32.mrf.mxu2 }
  0xf6   : > { %1644 = vmatmul.msk.bf16.gmra.mxu3 %vm454_vm3, %v2100_v24  ;;  %v821_v29 = vadd.f32 %v787_v56, %v619_v28 }
  0xf7   : > { %v965_v34 = vpop.f32.mrf.mxu0 }
  0xf9   : > { %v865_v57 = vpop.f32.mrf.mxu3  ;;  %v623_v58 = vpop.f32.mrf.mxu1 }
  0xfa   : > { %1654 = vmatmul.msk.bf16.gmra.mxu0 %vm454_vm3, %v2302_v17  ;;  %v899_v59 = vadd.f32 %v865_v57, %v821_v29  ;;  %v624_v27 = vadd.f32 %v623_v58, %v2380_v30 }
  0xfc   : > { %1623 = vmatmul.msk.bf16.gmra.mxu1 %vm454_vm3, %v2302_v17  ;;  %v2454_v3 = vadd.f32 %v965_v34, %v899_v59 }
  0xfd   : > { %v789_v53 = vpop.f32.mrf.mxu2 }
  0xfe   : > { %v822_v51 = vadd.f32 %v789_v53, %v621_v49  ;;  %v2492_v53 = vld [vmem:[%s2020_s6 + $0x6c] sm:$0xf] }
  0xff   : > { %v967_v4 = vpop.f32.mrf.mxu0 }
 0x101   : > { %v867_v16 = vpop.f32.mrf.mxu3  ;;  %v625_v24 = vpop.f32.mrf.mxu1 }
 0x102   : > { %v900_v6 = vadd.f32 %v867_v16, %v822_v51  ;;  %1636 = vmatmul.msk.bf16.gmra.mxu2 %vm454_vm3, %v2308_v13  ;;  %v626_v62 = vadd.f32 %v625_v24, %v2396_v31  ;;  %v2495_v51 = vld [vmem:[%s2020_s6 + $0x70] sm:$0xf]  ;;  %v1174_v24 = vshrl.u32 %v2492_v53, 16 }
 0x104   : > { %v2459_v19 = vadd.f32 %v967_v4, %v900_v6  ;;  %v1618_v6 = vrot.slane %v2343_v40, 9 }
 0x105   : > { %v792_v7 = vpop.f32.mrf.mxu2 }
 0x106   : > { %1645 = vmatmul.msk.bf16.gmra.mxu3 %vm454_vm3, %v2185_v32  ;;  %v823_v17 = vadd.f32 %v792_v7, %v624_v27  ;;  %v1014_v27 = vrot.slane %v2346_v46, 5  ;;  %v1187_v7 = vshrl.u32 %v2495_v51, 16 }
 0x107   : > { %v970_v30 = vpop.f32.mrf.mxu0 }
 0x108   : > { %v1016_v46 = vrot.slane %v1014_v27, 4  ;;  %v1015_v40 = vsel %vm2212_vm7, %v1618_v6, %v1014_v27 }
 0x109   : > { %v870_v63 = vpop.f32.mrf.mxu3  ;;  %v628_v9 = vpop.f32.mrf.mxu1 }
 0x10a   : > { %1655 = vmatmul.msk.bf16.gmra.mxu0 %vm454_vm3, %v2322_v41  ;;  %v901_v15 = vadd.f32 %v870_v63, %v823_v17  ;;  %v629_v32 = vadd.f32 %v628_v9, %v2359_v48  ;;  %v1176_v9 = vrot.slane %v1174_v24, 4  ;;  %v1675_v24 = vld [vmem:[%s2020_s6 + $0x6c] sm:$0xff] }
 0x10c   : > { %1624 = vmatmul.msk.bf16.gmra.mxu1 %vm454_vm3, %v2322_v41  ;;  %v2467_v13 = vadd.f32 %v970_v30, %v901_v15 }
 0x10d   : > { %v794_v31 = vpop.f32.mrf.mxu2 }
 0x10e   : > { %v824_v18 = vadd.f32 %v794_v31, %v626_v62  ;;  %v1183_v62 = vshll.u32 %v2495_v51, 16 }
 0x10f   : > { %v972_v43 = vpop.f32.mrf.mxu0 }
 0x111   : > { %v872_v21 = vpop.f32.mrf.mxu3  ;;  %v630_v23 = vpop.f32.mrf.mxu1 }
 0x112   : > { %v902_v60 = vadd.f32 %v872_v21, %v824_v18  ;;  %1637 = vmatmul.msk.bf16.gmra.mxu2 %vm454_vm3, %v2328_v25  ;;  %v631_v45 = vadd.f32 %v630_v23, %v2384_v20  ;;  %v1189_v21 = vrot.slane %v1187_v7, 4  ;;  %v231_v23 = vld [vmem:[%s2020_s6 + $0x74] sm:$0x1] }
 0x114   : > { %v2472_v28 = vadd.f32 %v972_v43, %v902_v60  ;;  %v1185_v43 = vrot.slane %v1183_v62, 5 }
 0x115   : > { %v797_v37 = vpop.f32.mrf.mxu2 }
 0x116   : > { %1646 = vmatmul.msk.bf16.gmra.mxu3 %vm454_vm3, %v2121_v47  ;;  %v825_v41 = vadd.f32 %v797_v37, %v629_v32 }
 0x117   : > { %v975_v26 = vpop.f32.mrf.mxu0 }
 0x119   : > { %v875_v11 = vpop.f32.mrf.mxu3  ;;  %v633_v12 = vpop.f32.mrf.mxu1 }
 0x11a   : > { %1656 = vmatmul.msk.bf16.gmra.mxu0 %vm454_vm3, %v2350_v42  ;;  %v903_v50 = vadd.f32 %v875_v11, %v825_v41  ;;  %v634_v57 = vadd.f32 %v633_v12, %v2403_v35  ;;  %v1193_v11 = vshll.u32 %v231_v23, 16 }
 0x11c   : > { %1625 = vmatmul.msk.bf16.gmra.mxu1 %vm454_vm3, %v2350_v42  ;;  %v2481_v25 = vadd.f32 %v975_v26, %v903_v50  ;;  %v1190_v26 = vor.u32 %v1189_v21, %v1185_v43 }
 0x11d   : > { %v799_v48 = vpop.f32.mrf.mxu2 }
 0x11e   : > { %v826_v49 = vadd.f32 %v799_v48, %v631_v45 }
 0x11f   : > { %v977_v47 = vpop.f32.mrf.mxu0 }
 0x121   : > { %v877_v56 = vpop.f32.mrf.mxu3  ;;  %v635_v29 = vpop.f32.mrf.mxu1 }
 0x122   : > { %v904_v34 = vadd.f32 %v877_v56, %v826_v49  ;;  %1638 = vmatmul.msk.bf16.gmra.mxu2 %vm454_vm3, %v2364_v38  ;;  %v1017_v38 = vrot.slane %v2369_v61, 5  ;;  %v636_v17 = vadd.f32 %v635_v29, %v2415_v44  ;;  %v1191_v29 = vrot.slane %v1190_v26, 4 }
 0x124   : > { %v2486_v58 = vadd.f32 %v977_v47, %v904_v34  ;;  %v1018_v18 = vsel %vm2212_vm7, %v1016_v46, %v1017_v38  ;;  %v1195_v34 = vrot.slane %v1193_v11, 5 }
 0x125   : > { %v802_v20 = vpop.f32.mrf.mxu2  ;;  %v1022_v37 = vunpack.c.l.b16 %v1018_v18 }
 0x126   : > { %1647 = vmatmul.msk.bf16.gmra.mxu3 %vm454_vm3, %v2207_v1  ;;  %v827_v42 = vadd.f32 %v802_v20, %v634_v57  ;;  %v1177_v1 = vshll.u32 %v2492_v53, 16 }
 0x127   : > { %v980_v59 = vpop.f32.mrf.mxu0 }
 0x128   : > { %v1179_v15 = vrot.slane %v1177_v1, 5 }
 0x129   : > { %v880_v4 = vpop.f32.mrf.mxu3  ;;  %v638_v16 = vpop.f32.mrf.mxu1 }
 0x12a   : > { %1657 = vmatmul.msk.bf16.gmra.mxu0 %vm454_vm3, %v2388_v55  ;;  %v905_v35 = vadd.f32 %v880_v4, %v827_v42  ;;  %v1180_v41 = vor.u32 %v1179_v15, %v1176_v9  ;;  %v639_v12 = vadd.f32 %v638_v16, %v2371_v2  ;;  %v1279_v4 = vrot.slane %v231_v23, 5 }
 0x12c   : > { %1626 = vmatmul.msk.bf16.gmra.mxu1 %vm454_vm3, %v2388_v55  ;;  %v2508_v61 = vadd.f32 %v980_v59, %v905_v35  ;;  %v1021_v55 = vunpack.c.l.b16 %v1015_v40  ;;  %v1181_v47 = vrot.slane %v1180_v41, 4  ;;  %v1650_v59 = vrot.slane %v2492_v53, 9 }
 0x12d   : > { %v804_v30 = vpop.f32.mrf.mxu2 }
 0x12e   : > { %v828_v63 = vadd.f32 %v804_v30, %v636_v17  ;;  %v1023_v48 = vpack.c.b16 %v1022_v37, %v1021_v55  ;;  %v1186_v42 = vsel %vm2058_vm4, %v1181_v47, %v1185_v43 }
 0x12f   : > { %v982_v31 = vpop.f32.mrf.mxu0  ;;  %v1199_v1 = vunpack.c.l.b16 %v1186_v42 }
 0x131   : > { %v882_v44 = vpop.f32.mrf.mxu3  ;;  %v640_v60 = vpop.f32.mrf.mxu1 }
 0x132   : > { %v906_v32 = vadd.f32 %v882_v44, %v828_v63  ;;  %1639 = vmatmul.msk.bf16.gmra.mxu2 %vm454_vm3, %v2401_v8  ;;  %v1276_v8 = vrot.slane %v2495_v51, 5  ;;  %v641_v16 = vadd.f32 %v640_v60, %v2390_v22 }
 0x134   : > { %v2518_v50 = vadd.f32 %v982_v31, %v906_v32  ;;  %v1278_v27 = vrot.slane %v1276_v8, 4  ;;  %v1277_v36 = vsel %vm2212_vm7, %v1650_v59, %v1276_v8 }
 0x135   : > { %v807_v45 = vpop.f32.mrf.mxu2  ;;  %v1283_v30 = vunpack.c.l.b16 %v1277_v36 }
 0x136   : > { %1648 = vmatmul.msk.bf16.gmra.mxu3 %vm454_vm3, %v2407_v39  ;;  %v829_v49 = vadd.f32 %v807_v45, %v639_v12  ;;  %v1196_v39 = vsel %vm2058_vm4, %v1191_v29, %v1195_v34  ;;  %v1280_v53 = vsel %vm2212_vm7, %v1278_v27, %v1279_v4 }
 0x137   : > { %v985_v56 = vpop.f32.mrf.mxu0  ;;  %v1200_v6 = vunpack.c.l.b16 %v1196_v39  ;;  %v1284_v63 = vunpack.c.l.b16 %v1280_v53 }
 0x139   : > { %v885_v57 = vpop.f32.mrf.mxu3  ;;  %v643_v20 = vpop.f32.mrf.mxu1  ;;  %v1201_v22 = vpack.c.b16 %v1200_v6, %v1199_v1  ;;  %v1285_v40 = vpack.c.b16 %v1284_v63, %v1283_v30 }
 0x13a   : > { %1658 = vmatmul.msk.bf16.gmra.mxu0 %vm454_vm3, %v1023_v48  ;;  %v907_v2 = vadd.f32 %v885_v57, %v829_v49  ;;  %v644_v9 = vadd.f32 %v643_v20, %v2409_v10 }
 0x13c   : > { %1627 = vmatmul.msk.bf16.gmra.mxu1 %vm454_vm3, %v1023_v48  ;;  %v2531_v51 = vadd.f32 %v985_v56, %v907_v2  ;;  %v2554_v2 = vld [vmem:[%s2646_s2] ss:$0 sm:$0xff] }
 0x13d   : > { %v809_v38 = vpop.f32.mrf.mxu2 }
 0x13e   : > { %v830_v35 = vadd.f32 %v809_v38, %v641_v16 }
 0x13f   : > { %v987_v46 = vpop.f32.mrf.mxu0 }
 0x141   : > { %v887_v62 = vpop.f32.mrf.mxu3  ;;  %v645_v7 = vpop.f32.mrf.mxu1 }
 0x142   : > { %v908_v17 = vadd.f32 %v887_v62, %v830_v35  ;;  %1640 = vmatmul.msk.bf16.gmra.mxu2 %vm454_vm3, %v1675_v24  ;;  %v646_v44 = vadd.f32 %v645_v7, %v2417_v0 }
 0x144   : > { %v2540_v15 = vadd.f32 %v987_v46, %v908_v17 }
 0x145   : > { %v812_v31 = vpop.f32.mrf.mxu2 }
 0x146   : > { %1649 = vmatmul.msk.bf16.gmra.mxu3 %vm454_vm3, %v1201_v22  ;;  %v831_v18 = vadd.f32 %v812_v31, %v644_v9 }
 0x147   : > { %v990_v43 = vpop.f32.mrf.mxu0 }
 0x149   : > { %v890_v54 = vpop.f32.mrf.mxu3  ;;  %v1039_v21 = vpop.f32.mrf.mxu1 }
 0x14a   : > { %1659 = vmatmul.msk.bf16.gmra.mxu0 %vm454_vm3, %v1285_v40  ;;  %v909_v23 = vadd.f32 %v890_v54, %v831_v18  ;;  %v1079_v45 = vadd.f32 %v1039_v21, %v2427_v5 }
 0x14c   : > { %v2545_v60 = vadd.f32 %v990_v43, %v909_v23 }
 0x14d   : > { %v814_v32 = vpop.f32.mrf.mxu2 }
 0x14e   : > { %v832_v55 = vadd.f32 %v814_v32, %v646_v44 }
 0x14f   : > { %v992_v10 = vpop.f32.mrf.mxu0 }
 0x151   : > { %v892_v37 = vpop.f32.mrf.mxu3  ;;  %v1041_v41 = vpop.f32.mrf.mxu1 }
 0x152   : > { %v910_v26 = vadd.f32 %v892_v37, %v832_v55  ;;  %v1080_v29 = vadd.f32 %v1041_v41, %v2431_v14 }
 0x154   : > { %v2547_v11 = vadd.f32 %v992_v10, %v910_v26 }
 0x155   : > { %v1117_v12 = vpop.f32.mrf.mxu2 }
 0x156   : > { %v1157_v49 = vadd.f32 %v1117_v12, %v1079_v45 }
 0x157   : > { %v1301_v48 = vpop.f32.mrf.mxu0 }
 0x159   : > { %v1217_v47 = vpop.f32.mrf.mxu3  ;;  %v1044_v56 = vpop.f32.mrf.mxu1 }
 0x15a   : > { %v1257_v0 = vadd.f32 %v1217_v47, %v1157_v49  ;;  %v1081_v16 = vadd.f32 %v1044_v56, %v2440_v33 }
 0x15c   : > { %v1341_v20 = vadd.f32 %v1301_v48, %v1257_v0 }
 0x15d   : > { %v1119_v34 = vpop.f32.mrf.mxu2 }
 0x15e   : > { %v1158_v8 = vadd.f32 %v1119_v34, %v1080_v29  ;;  %v1361_v59 = vadd.f32 %v2554_v2, %v1341_v20 }
 0x15f   : > { %v1303_v57 = vpop.f32.mrf.mxu0 }
 0x160   : > { %v1377_v35 = vmax.f32 %v1361_v59, 0.0 }
 0x161   : > { %v1219_v42 = vpop.f32.mrf.mxu3  ;;  %v1046_v39 = vpop.f32.mrf.mxu1 }
 0x162   : > { %v1258_v5 = vadd.f32 %v1219_v42, %v1158_v8  ;;  %v1082_v62 = vadd.f32 %v1046_v39, %v2445_v52 }
 0x164   : > { %v1342_v27 = vadd.f32 %v1303_v57, %v1258_v5 }
 0x165   : > { %v1122_v4 = vpop.f32.mrf.mxu2 }
 0x166   : > { %v1362_v14 = vadd.f32 %v2554_v2, %v1342_v27  ;;  %v1159_v1 = vadd.f32 %v1122_v4, %v1081_v16 }
 0x167   : > { %v1306_v38 = vpop.f32.mrf.mxu0 }
 0x168   : > { %v1378_v24 = vmax.f32 %v1362_v14, 0.0 }
 0x169   : > { %v1222_v6 = vpop.f32.mrf.mxu3  ;;  %v1049_v46 = vpop.f32.mrf.mxu1 }
 0x16a   : > { %v1680_v36 = vpack.c.bf16 %v1378_v24, %v1377_v35  ;;  %v1259_v53 = vadd.f32 %v1222_v6, %v1159_v1  ;;  %v1083_v54 = vadd.f32 %v1049_v46, %v2454_v3 }
 0x16c   : > { %1681 = vst [vmem:[%s2562_s30] sm:$0xff] %v1680_v36   ;;  %v1343_v30 = vadd.f32 %v1306_v38, %v1259_v53 }
 0x16d   : > { %v1124_v7 = vpop.f32.mrf.mxu2 }
 0x16e   : > { %v1160_v17 = vadd.f32 %v1124_v7, %v1082_v62  ;;  %v1363_v31 = vadd.f32 %v2554_v2, %v1343_v30 }
 0x16f   : > { %v1308_v22 = vpop.f32.mrf.mxu0 }
 0x170   : > { %v1379_v23 = vmax.f32 %v1363_v31, 0.0 }
 0x171   : > { %v1224_v33 = vpop.f32.mrf.mxu3  ;;  %v1051_v63 = vpop.f32.mrf.mxu1 }
 0x172   : > { %v1260_v9 = vadd.f32 %v1224_v33, %v1160_v17  ;;  %v1084_v41 = vadd.f32 %v1051_v63, %v2459_v19 }
 0x174   : > { %v1344_v40 = vadd.f32 %v1308_v22, %v1260_v9 }
 0x175   : > { %v1127_v18 = vpop.f32.mrf.mxu2 }
 0x176   : > { %v1364_v43 = vadd.f32 %v2554_v2, %v1344_v40  ;;  %v1161_v52 = vadd.f32 %v1127_v18, %v1083_v54 }
 0x177   : > { %v1311_v21 = vpop.f32.mrf.mxu0 }
 0x178   : > { %v1380_v44 = vmax.f32 %v1364_v43, 0.0 }
 0x179   : > { %v1227_v32 = vpop.f32.mrf.mxu3  ;;  %v1054_v55 = vpop.f32.mrf.mxu1 }
 0x17a   : > { %v1685_v10 = vpack.c.bf16 %v1380_v44, %v1379_v23  ;;  %v1261_v37 = vadd.f32 %v1227_v32, %v1161_v52  ;;  %v1085_v8 = vadd.f32 %v1054_v55, %v2467_v13 }
 0x17c   : > { %1717 = vst [vmem:[%s2562_s30 + $0x8] sm:$0xff] %v1685_v10   ;;  %v1345_v48 = vadd.f32 %v1311_v21, %v1261_v37 }
 0x17d   : > { %v1129_v26 = vpop.f32.mrf.mxu2 }
 0x17e   : > { %v1162_v12 = vadd.f32 %v1129_v26, %v1084_v41  ;;  %v1365_v3 = vadd.f32 %v2554_v2, %v1345_v48 }
 0x17f   : > { %v1313_v45 = vpop.f32.mrf.mxu0 }
 0x180   : > { %v1381_v20 = vmax.f32 %v1365_v3, 0.0 }
 0x181   : > { %v1229_v49 = vpop.f32.mrf.mxu3  ;;  %v1056_v47 = vpop.f32.mrf.mxu1 }
 0x182   : > { %v1262_v56 = vadd.f32 %v1229_v49, %v1162_v12  ;;  %v1086_v4 = vadd.f32 %v1056_v47, %v2472_v28 }
 0x184   : > { %v1346_v0 = vadd.f32 %v1313_v45, %v1262_v56 }
 0x185   : > { %v1132_v29 = vpop.f32.mrf.mxu2 }
 0x186   : > { %v1366_v34 = vadd.f32 %v2554_v2, %v1346_v0  ;;  %v1163_v19 = vadd.f32 %v1132_v29, %v1085_v8 }
 0x187   : > { %v1316_v57 = vpop.f32.mrf.mxu0 }
 0x188   : > { %v1382_v42 = vmax.f32 %v1366_v34, 0.0 }
 0x189   : > { %v1232_v39 = vpop.f32.mrf.mxu3  ;;  %v1059_v5 = vpop.f32.mrf.mxu1 }
 0x18a   : > { %v1690_v59 = vpack.c.bf16 %v1382_v42, %v1381_v20  ;;  %v1263_v27 = vadd.f32 %v1232_v39, %v1163_v19  ;;  %v1087_v62 = vadd.f32 %v1059_v5, %v2481_v25 }
 0x18c   : > { %1718 = vst [vmem:[%s2562_s30 + $0x10] sm:$0xff] %v1690_v59   ;;  %v1347_v35 = vadd.f32 %v1316_v57, %v1263_v27 }
 0x18d   : > { %v1134_v14 = vpop.f32.mrf.mxu2 }
 0x18e   : > { %v1164_v16 = vadd.f32 %v1134_v14, %v1086_v4  ;;  %v1367_v13 = vadd.f32 %v2554_v2, %v1347_v35 }
 0x18f   : > { %v1318_v38 = vpop.f32.mrf.mxu0 }
 0x190   : > { %v1383_v17 = vmax.f32 %v1367_v13, 0.0 }
 0x191   : > { %v1234_v24 = vpop.f32.mrf.mxu3  ;;  %v1061_v1 = vpop.f32.mrf.mxu1 }
 0x192   : > { %v1264_v6 = vadd.f32 %v1234_v24, %v1164_v16  ;;  %v1088_v31 = vadd.f32 %v1061_v1, %v2486_v58 }
 0x194   : > { %v1348_v46 = vadd.f32 %v1318_v38, %v1264_v6 }
 0x195   : > { %v1137_v36 = vpop.f32.mrf.mxu2 }
 0x196   : > { %v1368_v53 = vadd.f32 %v2554_v2, %v1348_v46  ;;  %v1165_v28 = vadd.f32 %v1137_v36, %v1087_v62 }
 0x197   : > { %v1321_v7 = vpop.f32.mrf.mxu0 }
 0x198   : > { %v1384_v22 = vmax.f32 %v1368_v53, 0.0 }
 0x199   : > { %v1237_v30 = vpop.f32.mrf.mxu3  ;;  %v1064_v33 = vpop.f32.mrf.mxu1 }
 0x19a   : > { %v1695_v63 = vpack.c.bf16 %v1384_v22, %v1383_v17  ;;  %v1265_v9 = vadd.f32 %v1237_v30, %v1165_v28  ;;  %v1089_v10 = vadd.f32 %v1064_v33, %v2508_v61 }
 0x19c   : > { %1719 = vst [vmem:[%s2562_s30 + $0x18] sm:$0xff] %v1695_v63   ;;  %v1349_v54 = vadd.f32 %v1321_v7, %v1265_v9 }
 0x19d   : > { %v1139_v40 = vpop.f32.mrf.mxu2 }
 0x19e   : > { %v1166_v18 = vadd.f32 %v1139_v40, %v1088_v31  ;;  %v1369_v25 = vadd.f32 %v2554_v2, %v1349_v54 }
 0x19f   : > { %v1323_v43 = vpop.f32.mrf.mxu0 }
 0x1a0   : > { %v1385_v41 = vmax.f32 %v1369_v25, 0.0 }
 0x1a1   : > { %v1239_v21 = vpop.f32.mrf.mxu3  ;;  %v1066_v23 = vpop.f32.mrf.mxu1 }
 0x1a2   : > { %v1266_v44 = vadd.f32 %v1239_v21, %v1166_v18  ;;  %v1090_v47 = vadd.f32 %v1066_v23, %v2518_v50 }
 0x1a4   : > { %v1350_v52 = vadd.f32 %v1323_v43, %v1266_v44 }
 0x1a5   : > { %v1142_v32 = vpop.f32.mrf.mxu2 }
 0x1a6   : > { %v1370_v55 = vadd.f32 %v2554_v2, %v1350_v52  ;;  %v1167_v58 = vadd.f32 %v1142_v32, %v1089_v10 }
 0x1a7   : > { %v1326_v37 = vpop.f32.mrf.mxu0 }
 0x1a8   : > { %v1386_v26 = vmax.f32 %v1370_v55, 0.0 }
 0x1a9   : > { %v1242_v12 = vpop.f32.mrf.mxu3  ;;  %v1069_v48 = vpop.f32.mrf.mxu1 }
 0x1aa   : > { %v1700_v45 = vpack.c.bf16 %v1386_v26, %v1385_v41  ;;  %v1267_v49 = vadd.f32 %v1242_v12, %v1167_v58  ;;  %v1091_v39 = vadd.f32 %v1069_v48, %v2531_v51 }
 0x1ac   : > { %1720 = vst [vmem:[%s2562_s30 + $0x20] sm:$0xff] %v1700_v45   ;;  %v1351_v29 = vadd.f32 %v1326_v37, %v1267_v49 }
 0x1ad   : > { %v1144_v56 = vpop.f32.mrf.mxu2 }
 0x1ae   : > { %v1168_v3 = vadd.f32 %v1144_v56, %v1090_v47  ;;  %v1371_v61 = vadd.f32 %v2554_v2, %v1351_v29 }
 0x1af   : > { %v1328_v0 = vpop.f32.mrf.mxu0 }
 0x1b0   : > { %v1387_v59 = vmax.f32 %v1371_v61, 0.0 }
 0x1b1   : > { %v1244_v34 = vpop.f32.mrf.mxu3  ;;  %v1071_v20 = vpop.f32.mrf.mxu1 }
 0x1b2   : > { %v1268_v8 = vadd.f32 %v1244_v34, %v1168_v3  ;;  %v1092_v38 = vadd.f32 %v1071_v20, %v2540_v15 }
 0x1b4   : > { %v1352_v57 = vadd.f32 %v1328_v0, %v1268_v8 }
 0x1b5   : > { %v1147_v42 = vpop.f32.mrf.mxu2 }
 0x1b6   : > { %v1372_v19 = vadd.f32 %v2554_v2, %v1352_v57  ;;  %v1169_v50 = vadd.f32 %v1147_v42, %v1091_v39 }
 0x1b7   : > { %v1331_v5 = vpop.f32.mrf.mxu0 }
 0x1b8   : > { %v1388_v27 = vmax.f32 %v1372_v19, 0.0 }
 0x1b9   : > { %v1247_v4 = vpop.f32.mrf.mxu3  ;;  %v1074_v1 = vpop.f32.mrf.mxu1 }
 0x1ba   : > { %v1705_v14 = vpack.c.bf16 %v1388_v27, %v1387_v59  ;;  %v1269_v16 = vadd.f32 %v1247_v4, %v1169_v50  ;;  %v1093_v17 = vadd.f32 %v1074_v1, %v2545_v60 }
 0x1bc   : > { %1721 = vst [vmem:[%s2562_s30 + $0x28] sm:$0xff] %v1705_v14   ;;  %v1353_v13 = vadd.f32 %v1331_v5, %v1269_v16 }
 0x1bd   : > { %v1149_v35 = vpop.f32.mrf.mxu2 }
 0x1be   : > { %v1170_v24 = vadd.f32 %v1149_v35, %v1092_v38  ;;  %v1373_v51 = vadd.f32 %v2554_v2, %v1353_v13 }
 0x1bf   : > { %v1333_v6 = vpop.f32.mrf.mxu0 }
 0x1c0   : > { %v1389_v22 = vmax.f32 %v1373_v51, 0.0 }
 0x1c1   : > { %v1249_v46 = vpop.f32.mrf.mxu3  ;;  %v1076_v30 = vpop.f32.mrf.mxu1 }
 0x1c2   : > { %v1270_v36 = vadd.f32 %v1249_v46, %v1170_v24  ;;  %v1094_v40 = vadd.f32 %v1076_v30, %v2547_v11 }
 0x1c4   : > { %v1354_v53 = vadd.f32 %v1333_v6, %v1270_v36 }
 0x1c5   : > { %v1152_v62 = vpop.f32.mrf.mxu2 }
 0x1c6   : > { %v1374_v7 = vadd.f32 %v2554_v2, %v1354_v53  ;;  %v1171_v15 = vadd.f32 %v1152_v62, %v1093_v17 }
 0x1c7   : > { %v1336_v33 = vpop.f32.mrf.mxu0 }
 0x1c8   : > { %v1390_v28 = vmax.f32 %v1374_v7, 0.0 }
 0x1c9   : > { %v1252_v63 = vpop.f32.mrf.mxu3 }
 0x1ca   : > { %v1710_v9 = vpack.c.bf16 %v1390_v28, %v1389_v22  ;;  %v1271_v31 = vadd.f32 %v1252_v63, %v1171_v15 }
 0x1cc   : > { %1722 = vst [vmem:[%s2562_s30 + $0x30] sm:$0xff] %v1710_v9   ;;  %v1355_v54 = vadd.f32 %v1336_v33, %v1271_v31 }
 0x1cd   : > { %v1154_v18 = vpop.f32.mrf.mxu2 }
 0x1ce   : > { %v1172_v43 = vadd.f32 %v1154_v18, %v1094_v40  ;;  %v1375_v44 = vadd.f32 %v2554_v2, %v1355_v54 }
 0x1cf   : > { %v1338_v23 = vpop.f32.mrf.mxu0 }
 0x1d0   : > { %v1391_v11 = vmax.f32 %v1375_v44, 0.0 }
 0x1d1   : > { %v1254_v21 = vpop.f32.mrf.mxu3 }
 0x1d2   : > { %v1272_v60 = vadd.f32 %v1254_v21, %v1172_v43 }
 0x1d4   : > { %v1356_v25 = vadd.f32 %v1338_v23, %v1272_v60 }
 0x1d6   : > { %v1376_v52 = vadd.f32 %v2554_v2, %v1356_v25 }
 0x1d8   : > { %v1392_v32 = vmax.f32 %v1376_v52, 0.0 }
 0x1da   : > { %v1715_v55 = vpack.c.bf16 %v1392_v32, %v1391_v11 }
 0x1dc   : > { %1723 = vst [vmem:[%s2562_s30 + $0x38] sm:$0xff] %v1715_v55  }
 0x1dd   : > { %1829 = shalt.err (!%p1826_p6)
}
 0x1de   : > { %s1898_s28 = smov 64   ;;  %s1899_s30 = smov 4  }
 0x1df   : > { %1728 = dma.vmem_to_hbm [thread:$0]  (%p1973_p5), %s1441_s10, 1024, %s1443_s11, %s1426_s9, %s1898_s28, %s1898_s28, %s1899_s30  }
 0x1e0 PF: > { %p1734_p8 = scmp.ge.s32.totalorder %s1896_s19, 2  ;;  %s1457_s4 = sand.u32 1, %s1868_s12  }
 0x1e1   : > { %s1458_s6 = scalar_lea.sflag [#allocation3], %s1457_s4 }
 0x1e2   : > { %p1731_p9 = pnand %p1734_p8, %p1979_p7 }
 0x1e4   : > { %p1732_p10 = pneg %p1731_p9 }
 0x1e6   : > { %1863 = dma.done.wait (%p1732_p10), %s1458_s6, 1024  }
 0x1e7   : > { %1865 = vsyncadd (%p1732_p10), %s1458_s6, 4294966272  ;;  %s16_s19 = sadd.s32 1, %s1896_s19   ;;  %s2654_s12 = smov %s1872_s13 }
 0x1e8   : > { %p13_p11 = scmp.ge.s32.totalorder %s16_s19, 6   ;;  %s2655_s13 = smov %s1876_s14 }
 0x1e9   : > { %s2656_s14 = smov %s1989_s5  ;;  %s2657_s15 = smov %s1888_s17 }
 0x1ea   : > { %s2658_s16 = smov %s1892_s18  ;;  %s2659_s17 = smov %s2662_s21 }
 0x1eb   : > { %s2660_s18 = smov %s2666_s22  ;;  %15 = sbr.rel (!%p13_p11) target bundleno = 5 (0x5), region = 75 }
 0x1f0   :  { %1464 = vsyncpa [#allocation3], 1 }
 0x1f1   :  { %1466 = vsyncpa [#allocation3 + $0x1], 1 }

</bundles_post_ra>
